<compile_context>
chip_gen: v6e
topology: v6e:2x2x1
jax: 0.10.0
libtpu: 0.0.40
codegen_flags: <defaults>
</compile_context>

<pallas_src>
import math

import jax
import jax.numpy as jnp
from jax.experimental import pallas as pl
from jax.experimental.pallas import tpu as pltpu


def _pick_tile(dim, want, align):
    """Largest tile <= want that is a multiple of `align` and divides dim, else full dim."""
    t = min(want, dim)
    t -= t % align
    while t >= align:
        if dim % t == 0:
            return t
        t -= align
    return dim


def _make_mha_kernel(*, scale, with_mask, with_scores, approx_recip):
    def kernel(*refs):
        xq_ref, xk_ref, xv_ref, wq_ref, wk_ref, wv_ref, wo_ref = refs[:7]
        pos = 7
        m_ref = None
        if with_mask:
            m_ref = refs[pos]
            pos += 1
        o_ref = refs[pos]
        pos += 1
        p_ref = None
        if with_scores:
            p_ref = refs[pos]
            pos += 1
        acc_ref, k_cache, v_cache = refs[pos], refs[pos + 1], refs[pos + 2]

        qi = pl.program_id(1)
        h = pl.program_id(2)
        cdt = xq_ref.dtype  # compute dtype chosen by the wrapper (f32 or bf16)

        # K/V projection for this head: once per (batch, head), reused across q tiles.
        @pl.when(qi == 0)
        def _():
            k_cache[h] = jnp.dot(
                xk_ref[...], wk_ref[...], preferred_element_type=jnp.float32
            ).astype(k_cache.dtype)
            v_cache[h] = jnp.dot(
                xv_ref[...], wv_ref[...], preferred_element_type=jnp.float32
            ).astype(v_cache.dtype)

        # Q projection for this (q tile, head).
        q = jnp.dot(
            xq_ref[...], wq_ref[...], preferred_element_type=jnp.float32
        ).astype(cdt)                                    # (tq, d_k)
        k = k_cache[h]                                   # (S, d_k)
        v = v_cache[h]                                   # (S, d_k)

        # scores = (q @ k^T) / sqrt(d_k): contract last dims, no explicit transpose.
        s = jax.lax.dot_general(
            q, k, (((1,), (1,)), ((), ())), preferred_element_type=jnp.float32
        ) * scale                                        # (tq, S) f32
        if with_mask:
            s = jnp.where(m_ref[...] == 0, jnp.float32(-1e9), s)

        # Softmax with f32 statistics; denominator via EUP reciprocal if requested.
        m = jnp.max(s, axis=-1, keepdims=True)
        e = jnp.exp(s - m)
        p = e * pl.reciprocal(jnp.sum(e, axis=-1, keepdims=True), approx=approx_recip)
        if with_scores:
            p_ref[...] = p

        # Context and fused per-head slice of the output projection.
        ctx = jnp.dot(
            p.astype(cdt), v, preferred_element_type=jnp.float32
        ).astype(cdt)                                    # (tq, d_k)
        contrib = jnp.dot(
            ctx, wo_ref[...], preferred_element_type=jnp.float32
        )                                                # (tq, d_model)

        # Accumulate head contributions (head axis is the reduction axis).
        @pl.when(h == 0)
        def _():
            acc_ref[...] = jnp.zeros_like(acc_ref)

        acc_ref[...] += contrib

        @pl.when(h == pl.num_programs(2) - 1)
        def _():
            o_ref[...] = acc_ref[...].astype(o_ref.dtype)

    return kernel


def _normalize_mask(mask, B, H, S):
    m = jnp.asarray(mask)
    while m.ndim < 4:
        m = m[None]
    Hm = H if m.shape[1] == H else 1
    return jnp.broadcast_to(m, (B, Hm, S, S)).astype(jnp.int32)


def mha_forward(xq, xk, xv, wq_h, wk_h, wv_h, wo_h, mask=None, *,
                return_scores=True, compute_dtype=jnp.float32,
                approx_reciprocal=True, q_tile=256):
    """Fused multi-head attention forward.

    xq/xk/xv: (B, S, d_model). wq_h/wk_h/wv_h: (H, d_model, d_k) per-head
    projection weights (x @ w gives the head's features). wo_h: (H, d_k,
    d_model) per-head slices of the output projection. Returns (out, probs|None).
    """
    B, S, D = xq.shape
    H, _, dk = wq_h.shape
    scale = 1.0 / math.sqrt(dk)

    tq = _pick_tile(S, q_tile, 8)
    nq = S // tq
    cdt = compute_dtype

    inputs = [xq.astype(cdt), xk.astype(cdt), xv.astype(cdt),
              wq_h.astype(cdt), wk_h.astype(cdt), wv_h.astype(cdt), wo_h.astype(cdt)]

    in_specs = [
        pl.BlockSpec((None, tq, D), lambda b, qi, h: (b, qi, 0)),   # x_q tile
        pl.BlockSpec((None, S, D), lambda b, qi, h: (b, 0, 0)),     # x_k (DMA'd once per b)
        pl.BlockSpec((None, S, D), lambda b, qi, h: (b, 0, 0)),     # x_v (DMA'd once per b)
        pl.BlockSpec((None, D, dk), lambda b, qi, h: (h, 0, 0)),    # W_q[h]
        pl.BlockSpec((None, D, dk), lambda b, qi, h: (h, 0, 0)),    # W_k[h]
        pl.BlockSpec((None, D, dk), lambda b, qi, h: (h, 0, 0)),    # W_v[h]
        pl.BlockSpec((None, dk, D), lambda b, qi, h: (h, 0, 0)),    # W_o[h]
    ]

    with_mask = mask is not None
    if with_mask:
        mask4 = _normalize_mask(mask, B, H, S)
        if mask4.shape[1] == 1:   # head-broadcast mask: never replicated over H in HBM
            in_specs.append(
                pl.BlockSpec((None, None, tq, S), lambda b, qi, h: (b, 0, qi, 0)))
        else:
            in_specs.append(
                pl.BlockSpec((None, None, tq, S), lambda b, qi, h: (b, h, qi, 0)))
        inputs.append(mask4)

    out_shapes = [jax.ShapeDtypeStruct((B, S, D), jnp.float32)]
    out_specs = [pl.BlockSpec((None, tq, D), lambda b, qi, h: (b, qi, 0))]
    if return_scores:
        out_shapes.append(jax.ShapeDtypeStruct((B, H, S, S), jnp.float32))
        out_specs.append(
            pl.BlockSpec((None, None, tq, S), lambda b, qi, h: (b, h, qi, 0)))

    kernel = _make_mha_kernel(scale=scale, with_mask=with_mask,
                              with_scores=return_scores,
                              approx_recip=approx_reciprocal)

    results = pl.pallas_call(
        kernel,
        out_shape=tuple(out_shapes),
        grid=(B, nq, H),
        in_specs=in_specs,
        out_specs=tuple(out_specs),
        scratch_shapes=[
            pltpu.VMEM((tq, D), jnp.float32),   # output accumulator over heads
            pltpu.VMEM((H, S, dk), cdt),        # cached per-head K projections
            pltpu.VMEM((H, S, dk), cdt),        # cached per-head V projections
        ],
        # Batch axis is parallel (megacore); q-tile axis stays "arbitrary"
        # because the K/V scratch cache carries state across q tiles; head axis
        # is the output-reduction axis.
        compiler_params=pltpu.CompilerParams(
            dimension_semantics=("parallel", "arbitrary", "arbitrary")),
    )(*inputs)

    if return_scores:
        out, probs = results
    else:
        out = results[0] if isinstance(results, (tuple, list)) else results
        probs = None
    return out, probs


class MultiHeadAttention:
    """Pallas-TPU port of the PyTorch MultiHeadAttention module (eval mode)."""

    def __init__(self, d_model: int, h: int, key, dropout: float = 0.1):
        assert d_model % h == 0, "d_model must be divisible by heads"
        self.d_model = d_model
        self.h = h
        self.d_k = d_model // h
        k1, k2, k3, k4 = jax.random.split(key, 4)
        # torch.rand-style init U[0,1); nn.Linear semantics y = x @ W.T (no bias).
        self.w_q = jax.random.uniform(k1, (d_model, d_model), jnp.float32)
        self.w_k = jax.random.uniform(k2, (d_model, d_model), jnp.float32)
        self.w_v = jax.random.uniform(k3, (d_model, d_model), jnp.float32)
        self.w_o = jax.random.uniform(k4, (d_model, d_model), jnp.float32)
        # One-time *parameter-side* re-layouts so the kernel never transposes
        # activations: per-head (d_model, d_k) projection slices and per-head
        # (d_k, d_model) slices of the output projection.
        dk = self.d_k
        self.wq_heads = self.w_q.reshape(h, dk, d_model).transpose(0, 2, 1)
        self.wk_heads = self.w_k.reshape(h, dk, d_model).transpose(0, 2, 1)
        self.wv_heads = self.w_v.reshape(h, dk, d_model).transpose(0, 2, 1)
        self.wo_heads = self.w_o.T.reshape(h, dk, d_model)
        self.attention_scores = None
        # TODO(synk): training-mode dropout not modeled (nn.Dropout = identity in eval).

    def __call__(self, q, k, v, mask=None, *, return_scores=True,
                 compute_dtype=jnp.float32, approx_reciprocal=True, q_tile=256):
        out, probs = mha_forward(
            q, k, v,
            self.wq_heads, self.wk_heads, self.wv_heads, self.wo_heads,
            mask=mask, return_scores=return_scores, compute_dtype=compute_dtype,
            approx_reciprocal=approx_reciprocal, q_tile=q_tile)
        if return_scores:
            self.attention_scores = probs
        return out


# ----------------------------------------------------------------------------
# Pure-JAX reference for correctness checks
# ----------------------------------------------------------------------------
def reference(mha, q, k, v, mask=None):
    B, S, _ = q.shape

    def proj(x, w):
        y = jnp.einsum("bsd,ed->bse", x, w)
        return jnp.transpose(y.reshape(B, S, mha.h, mha.d_k), (0, 2, 1, 3))

    qh, kh, vh = proj(q, mha.w_q), proj(k, mha.w_k), proj(v, mha.w_v)
    s = jnp.einsum("bhqd,bhkd->bhqk", qh, kh) / math.sqrt(mha.d_k)
    if mask is not None:
        s = jnp.where(jnp.asarray(mask) == 0, -1e9, s)
    a = jax.nn.softmax(s, axis=-1)
    o = jnp.einsum("bhqk,bhkd->bhqd", a, vh)
    o = jnp.transpose(o, (0, 2, 1, 3)).reshape(B, S, mha.d_model)
    return jnp.einsum("bsd,ed->bse", o, mha.w_o), a


if __name__ == "__main__":
    d_model, h, B, S = 32, 4, 2, 8
    key = jax.random.PRNGKey(0)
    k_param, k_q, k_k, k_v = jax.random.split(key, 4)

    mha = MultiHeadAttention(d_model, h, k_param)

    q = jax.random.normal(k_q, (B, S, d_model), jnp.float32)
    k = jax.random.normal(k_k, (B, S, d_model), jnp.float32)
    v = jax.random.normal(k_v, (B, S, d_model), jnp.float32)

    # 1) mask=None path (the PyTorch forward's call pattern), f32, exact
    #    reciprocal for a strict numerical comparison against the reference.
    out = jax.block_until_ready(mha(q, k, v, approx_reciprocal=False))
    ref_out, ref_probs = reference(mha, q, k, v, mask=None)
    assert out.shape == (B, S, d_model)
    assert jnp.allclose(out, ref_out, atol=2e-4, rtol=2e-4), "mismatch (no mask)"
    assert mha.attention_scores.shape == (B, h, S, S)
    assert jnp.allclose(mha.attention_scores, ref_probs, atol=2e-4, rtol=2e-4), \
        "attention_scores mismatch (no mask)"

    # 2) masked path (causal mask shared across heads, never replicated in HBM).
    causal = jnp.tril(jnp.ones((S, S), dtype=jnp.int32))[None, None]  # (1,1,S,S)
    out_m = jax.block_until_ready(mha(q, k, v, mask=causal, approx_reciprocal=False))
    ref_out_m, ref_probs_m = reference(mha, q, k, v, mask=causal)
    assert jnp.allclose(out_m, ref_out_m, atol=2e-4, rtol=2e-4), "mismatch (masked)"
    assert jnp.allclose(mha.attention_scores, ref_probs_m, atol=2e-4, rtol=2e-4), \
        "attention_scores mismatch (masked)"

    # 3) Performance configuration: bf16 MXU inputs with f32 accumulation,
    #    EUP approximate reciprocal, no O(S^2) probability writeback.
    out_fast = jax.block_until_ready(
        mha(q, k, v, return_scores=False,
            compute_dtype=jnp.bfloat16, approx_reciprocal=True))
    assert out_fast.shape == (B, S, d_model)
    assert bool(jnp.all(jnp.isfinite(out_fast)))

    print("KERNEL_OK")
</pallas_src>

<mosaic_0001>
module attributes {stable_mosaic.version = 11 : i64} {
  func.func @kernel(%arg0: i32, %arg1: i32, %arg2: i32, %arg3: memref<1x8x32xf32, #tpu.memory_space<vmem>>, %arg4: memref<1x8x32xf32, #tpu.memory_space<vmem>>, %arg5: memref<1x8x32xf32, #tpu.memory_space<vmem>>, %arg6: memref<1x32x8xf32, #tpu.memory_space<vmem>>, %arg7: memref<1x32x8xf32, #tpu.memory_space<vmem>>, %arg8: memref<1x32x8xf32, #tpu.memory_space<vmem>>, %arg9: memref<1x8x32xf32, #tpu.memory_space<vmem>>, %arg10: memref<1x8x32xf32, #tpu.memory_space<vmem>>, %arg11: memref<1x1x8x8xf32, #tpu.memory_space<vmem>>, %arg12: memref<8x32xf32, #tpu.memory_space<vmem>>, %arg13: memref<4x8x8xf32, #tpu.memory_space<vmem>>, %arg14: memref<4x8x8xf32, #tpu.memory_space<vmem>>) attributes {dimension_semantics = [#tpu.dimension_semantics<parallel>, #tpu.dimension_semantics<arbitrary>, #tpu.dimension_semantics<arbitrary>], iteration_bounds = array<i64: 2, 1, 4>, scalar_prefetch = 0 : i64, scratch_operands = 3 : i64, tpu.core_type = #tpu.core_type<tc>, window_params = [{transform_indices = @transform_0, window_bounds = array<i64: 1, 8, 32>}, {transform_indices = @transform_1, window_bounds = array<i64: 1, 8, 32>}, {transform_indices = @transform_2, window_bounds = array<i64: 1, 8, 32>}, {transform_indices = @transform_3, window_bounds = array<i64: 1, 32, 8>}, {transform_indices = @transform_4, window_bounds = array<i64: 1, 32, 8>}, {transform_indices = @transform_5, window_bounds = array<i64: 1, 32, 8>}, {transform_indices = @transform_6, window_bounds = array<i64: 1, 8, 32>}, {transform_indices = @transform_7, window_bounds = array<i64: 1, 8, 32>}, {transform_indices = @transform_8, window_bounds = array<i64: 1, 1, 8, 8>}]} {
    %c0_i32 = arith.constant 0 : i32
    %0 = arith.cmpi eq, %arg1, %c0_i32 : i32
    %1 = arith.extui %0 : i1 to i32
    %c0_i32_0 = arith.constant 0 : i32
    %2 = arith.cmpi ne, %1, %c0_i32_0 : i32
    scf.if %2 {
      %c0_30 = arith.constant 0 : index
      %c0_31 = arith.constant 0 : index
      %c0_32 = arith.constant 0 : index
      %43 = vector.load %arg4[%c0_30, %c0_31, %c0_32] : memref<1x8x32xf32, #tpu.memory_space<vmem>>, vector<1x8x32xf32>
      %44 = vector.shape_cast %43 : vector<1x8x32xf32> to vector<8x32xf32>
      %c0_33 = arith.constant 0 : index
      %c0_34 = arith.constant 0 : index
      %c0_35 = arith.constant 0 : index
      %45 = vector.load %arg7[%c0_33, %c0_34, %c0_35] : memref<1x32x8xf32, #tpu.memory_space<vmem>>, vector<1x32x8xf32>
      %46 = vector.shape_cast %45 : vector<1x32x8xf32> to vector<32x8xf32>
      %cst_36 = arith.constant dense<0.000000e+00> : vector<8x8xf32>
      %47 = tpu.matmul %44, %46, %cst_36 {dimension_numbers = #tpu.dot_dimension_numbers<[1], [0], [0], [1], [0, 0, 1, 1], [], []>} : vector<8x32xf32>, vector<32x8xf32>, vector<8x8xf32> -> vector<8x8xf32>
      %48 = arith.index_cast %arg2 : i32 to index
      %c0_37 = arith.constant 0 : index
      %c0_38 = arith.constant 0 : index
      %49 = vector.load %arg13[%48, %c0_37, %c0_38] : memref<4x8x8xf32, #tpu.memory_space<vmem>>, vector<1x8x8xf32>
      %50 = vector.shape_cast %49 : vector<1x8x8xf32> to vector<8x8xf32>
      %51 = vector.shape_cast %47 : vector<8x8xf32> to vector<1x8x8xf32>
      tpu.vector_store %arg13[%48, %c0_37, %c0_38], %51 {strides = array<i32>} : memref<4x8x8xf32, #tpu.memory_space<vmem>>, vector<1x8x8xf32>,
      %c0_39 = arith.constant 0 : index
      %c0_40 = arith.constant 0 : index
      %c0_41 = arith.constant 0 : index
      %52 = vector.load %arg5[%c0_39, %c0_40, %c0_41] : memref<1x8x32xf32, #tpu.memory_space<vmem>>, vector<1x8x32xf32>
      %53 = vector.shape_cast %52 : vector<1x8x32xf32> to vector<8x32xf32>
      %c0_42 = arith.constant 0 : index
      %c0_43 = arith.constant 0 : index
      %c0_44 = arith.constant 0 : index
      %54 = vector.load %arg8[%c0_42, %c0_43, %c0_44] : memref<1x32x8xf32, #tpu.memory_space<vmem>>, vector<1x32x8xf32>
      %55 = vector.shape_cast %54 : vector<1x32x8xf32> to vector<32x8xf32>
      %cst_45 = arith.constant dense<0.000000e+00> : vector<8x8xf32>
      %56 = tpu.matmul %53, %55, %cst_45 {dimension_numbers = #tpu.dot_dimension_numbers<[1], [0], [0], [1], [0, 0, 1, 1], [], []>} : vector<8x32xf32>, vector<32x8xf32>, vector<8x8xf32> -> vector<8x8xf32>
      %57 = arith.index_cast %arg2 : i32 to index
      %c0_46 = arith.constant 0 : index
      %c0_47 = arith.constant 0 : index
      %58 = vector.load %arg14[%57, %c0_46, %c0_47] : memref<4x8x8xf32, #tpu.memory_space<vmem>>, vector<1x8x8xf32>
      %59 = vector.shape_cast %58 : vector<1x8x8xf32> to vector<8x8xf32>
      %60 = vector.shape_cast %56 : vector<8x8xf32> to vector<1x8x8xf32>
      tpu.vector_store %arg14[%57, %c0_46, %c0_47], %60 {strides = array<i32>} : memref<4x8x8xf32, #tpu.memory_space<vmem>>, vector<1x8x8xf32>,
    } else {
    }
    %c0 = arith.constant 0 : index
    %c0_1 = arith.constant 0 : index
    %c0_2 = arith.constant 0 : index
    %3 = vector.load %arg3[%c0, %c0_1, %c0_2] : memref<1x8x32xf32, #tpu.memory_space<vmem>>, vector<1x8x32xf32>
    %4 = vector.shape_cast %3 : vector<1x8x32xf32> to vector<8x32xf32>
    %c0_3 = arith.constant 0 : index
    %c0_4 = arith.constant 0 : index
    %c0_5 = arith.constant 0 : index
    %5 = vector.load %arg6[%c0_3, %c0_4, %c0_5] : memref<1x32x8xf32, #tpu.memory_space<vmem>>, vector<1x32x8xf32>
    %6 = vector.shape_cast %5 : vector<1x32x8xf32> to vector<32x8xf32>
    %cst = arith.constant dense<0.000000e+00> : vector<8x8xf32>
    %7 = tpu.matmul %4, %6, %cst {dimension_numbers = #tpu.dot_dimension_numbers<[1], [0], [0], [1], [0, 0, 1, 1], [], []>} : vector<8x32xf32>, vector<32x8xf32>, vector<8x8xf32> -> vector<8x8xf32>
    %8 = arith.index_cast %arg2 : i32 to index
    %c0_6 = arith.constant 0 : index
    %c0_7 = arith.constant 0 : index
    %9 = vector.load %arg13[%8, %c0_6, %c0_7] : memref<4x8x8xf32, #tpu.memory_space<vmem>>, vector<1x8x8xf32>
    %10 = vector.shape_cast %9 : vector<1x8x8xf32> to vector<8x8xf32>
    %11 = arith.index_cast %arg2 : i32 to index
    %c0_8 = arith.constant 0 : index
    %c0_9 = arith.constant 0 : index
    %12 = vector.load %arg14[%11, %c0_8, %c0_9] : memref<4x8x8xf32, #tpu.memory_space<vmem>>, vector<1x8x8xf32>
    %13 = vector.shape_cast %12 : vector<1x8x8xf32> to vector<8x8xf32>
    %cst_10 = arith.constant dense<0.000000e+00> : vector<8x8xf32>
    %14 = tpu.matmul %7, %10, %cst_10 {dimension_numbers = #tpu.dot_dimension_numbers<[1], [1], [0], [0], [0, 0, 1, 0], [], []>} : vector<8x8xf32>, vector<8x8xf32>, vector<8x8xf32> -> vector<8x8xf32>
    %cst_11 = arith.constant 0.353553385 : f32
    %15 = vector.broadcast %cst_11 : f32 to vector<8x8xf32>
    %16 = arith.mulf %14, %15 : vector<8x8xf32>
    %cst_12 = arith.constant dense<0xFF800000> : vector<8xf32>
    %17 = vector.multi_reduction <maximumf>, %16, %cst_12 [1] : vector<8x8xf32> to vector<8xf32>
    %18 = vector.shape_cast %17 : vector<8xf32> to vector<8x1xf32>
    %19 = vector.broadcast %18 : vector<8x1xf32> to vector<8x8xf32>
    %20 = arith.subf %16, %19 : vector<8x8xf32>
    %21 = math.exp %20 : vector<8x8xf32>
    %cst_13 = arith.constant dense<0.000000e+00> : vector<8xf32>
    %22 = vector.multi_reduction <add>, %21, %cst_13 [1] : vector<8x8xf32> to vector<8xf32>
    %23 = vector.shape_cast %22 : vector<8xf32> to vector<8x1xf32>
    %24 = tpu.reciprocal %23 : vector<8x1xf32> -> vector<8x1xf32>
    %25 = vector.broadcast %24 : vector<8x1xf32> to vector<8x8xf32>
    %26 = arith.mulf %21, %25 : vector<8x8xf32>
    %c0_14 = arith.constant 0 : index
    %c0_15 = arith.constant 0 : index
    %c0_16 = arith.constant 0 : index
    %c0_17 = arith.constant 0 : index
    %27 = vector.load %arg11[%c0_14, %c0_15, %c0_16, %c0_17] : memref<1x1x8x8xf32, #tpu.memory_space<vmem>>, vector<1x1x8x8xf32>
    %28 = vector.shape_cast %27 : vector<1x1x8x8xf32> to vector<8x8xf32>
    %29 = vector.shape_cast %26 : vector<8x8xf32> to vector<1x1x8x8xf32>
    tpu.vector_store %arg11[%c0_14, %c0_15, %c0_16, %c0_17], %29 {strides = array<i32>} : memref<1x1x8x8xf32, #tpu.memory_space<vmem>>, vector<1x1x8x8xf32>,
    %cst_18 = arith.constant dense<0.000000e+00> : vector<8x8xf32>
    %30 = tpu.matmul %26, %13, %cst_18 {dimension_numbers = #tpu.dot_dimension_numbers<[1], [0], [0], [1], [0, 0, 1, 1], [], []>} : vector<8x8xf32>, vector<8x8xf32>, vector<8x8xf32> -> vector<8x8xf32>
    %c0_19 = arith.constant 0 : index
    %c0_20 = arith.constant 0 : index
    %c0_21 = arith.constant 0 : index
    %31 = vector.load %arg9[%c0_19, %c0_20, %c0_21] : memref<1x8x32xf32, #tpu.memory_space<vmem>>, vector<1x8x32xf32>
    %32 = vector.shape_cast %31 : vector<1x8x32xf32> to vector<8x32xf32>
    %cst_22 = arith.constant dense<0.000000e+00> : vector<8x32xf32>
    %33 = tpu.matmul %30, %32, %cst_22 {dimension_numbers = #tpu.dot_dimension_numbers<[1], [0], [0], [1], [0, 0, 1, 1], [], []>} : vector<8x8xf32>, vector<8x32xf32>, vector<8x32xf32> -> vector<8x32xf32>
    %c0_i32_23 = arith.constant 0 : i32
    %34 = arith.cmpi eq, %arg2, %c0_i32_23 : i32
    %35 = arith.extui %34 : i1 to i32
    %c0_i32_24 = arith.constant 0 : i32
    %36 = arith.cmpi ne, %35, %c0_i32_24 : i32
    scf.if %36 {
      %cst_30 = arith.constant 0.000000e+00 : f32
      %43 = vector.broadcast %cst_30 : f32 to vector<8x32xf32>
      %c0_31 = arith.constant 0 : index
      %c0_32 = arith.constant 0 : index
      %44 = vector.load %arg12[%c0_31, %c0_32] : memref<8x32xf32, #tpu.memory_space<vmem>>, vector<8x32xf32>
      tpu.vector_store %arg12[%c0_31, %c0_32], %43 {strides = array<i32>} : memref<8x32xf32, #tpu.memory_space<vmem>>, vector<8x32xf32>,
    } else {
    }
    %c0_25 = arith.constant 0 : index
    %c0_26 = arith.constant 0 : index
    %37 = vector.load %arg12[%c0_25, %c0_26] : memref<8x32xf32, #tpu.memory_space<vmem>>, vector<8x32xf32>
    %38 = arith.addf %37, %33 : vector<8x32xf32>
    %c0_27 = arith.constant 0 : index
    %c0_28 = arith.constant 0 : index
    %39 = vector.load %arg12[%c0_27, %c0_28] : memref<8x32xf32, #tpu.memory_space<vmem>>, vector<8x32xf32>
    tpu.vector_store %arg12[%c0_27, %c0_28], %38 {strides = array<i32>} : memref<8x32xf32, #tpu.memory_space<vmem>>, vector<8x32xf32>,
    %c3_i32 = arith.constant 3 : i32
    %40 = arith.cmpi eq, %arg2, %c3_i32 : i32
    %41 = arith.extui %40 : i1 to i32
    %c0_i32_29 = arith.constant 0 : i32
    %42 = arith.cmpi ne, %41, %c0_i32_29 : i32
    scf.if %42 {
      %c0_30 = arith.constant 0 : index
      %c0_31 = arith.constant 0 : index
      %43 = vector.load %arg12[%c0_30, %c0_31] : memref<8x32xf32, #tpu.memory_space<vmem>>, vector<8x32xf32>
      %c0_32 = arith.constant 0 : index
      %c0_33 = arith.constant 0 : index
      %c0_34 = arith.constant 0 : index
      %44 = vector.load %arg10[%c0_32, %c0_33, %c0_34] : memref<1x8x32xf32, #tpu.memory_space<vmem>>, vector<1x8x32xf32>
      %45 = vector.shape_cast %44 : vector<1x8x32xf32> to vector<8x32xf32>
      %46 = vector.shape_cast %43 : vector<8x32xf32> to vector<1x8x32xf32>
      tpu.vector_store %arg10[%c0_32, %c0_33, %c0_34], %46 {strides = array<i32>} : memref<1x8x32xf32, #tpu.memory_space<vmem>>, vector<1x8x32xf32>,
    } else {
    }
    return
  }
  func.func @transform_0(%arg0: i32, %arg1: i32, %arg2: i32) -> (i32, i32, i32) {
    %c0_i32 = arith.constant 0 : i32
    %c0_i32_0 = arith.constant 0 : i32
    return %arg0, %arg1, %c0_i32 : i32, i32, i32
  }
  func.func @transform_1(%arg0: i32, %arg1: i32, %arg2: i32) -> (i32, i32, i32) {
    %c0_i32 = arith.constant 0 : i32
    %c0_i32_0 = arith.constant 0 : i32
    %c0_i32_1 = arith.constant 0 : i32
    return %arg0, %c0_i32, %c0_i32_0 : i32, i32, i32
  }
  func.func @transform_2(%arg0: i32, %arg1: i32, %arg2: i32) -> (i32, i32, i32) {
    %c0_i32 = arith.constant 0 : i32
    %c0_i32_0 = arith.constant 0 : i32
    %c0_i32_1 = arith.constant 0 : i32
    return %arg0, %c0_i32, %c0_i32_0 : i32, i32, i32
  }
  func.func @transform_3(%arg0: i32, %arg1: i32, %arg2: i32) -> (i32, i32, i32) {
    %c0_i32 = arith.constant 0 : i32
    %c0_i32_0 = arith.constant 0 : i32
    %c0_i32_1 = arith.constant 0 : i32
    return %arg2, %c0_i32, %c0_i32_0 : i32, i32, i32
  }
  func.func @transform_4(%arg0: i32, %arg1: i32, %arg2: i32) -> (i32, i32, i32) {
    %c0_i32 = arith.constant 0 : i32
    %c0_i32_0 = arith.constant 0 : i32
    %c0_i32_1 = arith.constant 0 : i32
    return %arg2, %c0_i32, %c0_i32_0 : i32, i32, i32
  }
  func.func @transform_5(%arg0: i32, %arg1: i32, %arg2: i32) -> (i32, i32, i32) {
    %c0_i32 = arith.constant 0 : i32
    %c0_i32_0 = arith.constant 0 : i32
    %c0_i32_1 = arith.constant 0 : i32
    return %arg2, %c0_i32, %c0_i32_0 : i32, i32, i32
  }
  func.func @transform_6(%arg0: i32, %arg1: i32, %arg2: i32) -> (i32, i32, i32) {
    %c0_i32 = arith.constant 0 : i32
    %c0_i32_0 = arith.constant 0 : i32
    %c0_i32_1 = arith.constant 0 : i32
    return %arg2, %c0_i32, %c0_i32_0 : i32, i32, i32
  }
  func.func @transform_7(%arg0: i32, %arg1: i32, %arg2: i32) -> (i32, i32, i32) {
    %c0_i32 = arith.constant 0 : i32
    %c0_i32_0 = arith.constant 0 : i32
    return %arg0, %arg1, %c0_i32 : i32, i32, i32
  }
  func.func @transform_8(%arg0: i32, %arg1: i32, %arg2: i32) -> (i32, i32, i32, i32) {
    %c0_i32 = arith.constant 0 : i32
    %c0_i32_0 = arith.constant 0 : i32
    return %arg0, %arg2, %arg1, %c0_i32 : i32, i32, i32, i32
  }
}

</mosaic_0001>

<bundles_post_ra>
// kernel: tpu_custom_call.1
= control target key start
LH: loop header
LB: loop body
LE: loop exit
PB: predicated region body
PF: predicated region fallthrough
CT: control target
= control target key end

     0   :  { %s1896_s0 = inlined_call_operand.vmem [shape: f32[2,8,32], index: 0, kind: input, shape index: {}]   ;;  %s1897_s1 = inlined_call_operand.vmem [shape: f32[2,8,32], index: 1, kind: input, shape index: {}]   ;;  %s1898_s2 = inlined_call_operand.vmem [shape: f32[2,8,32], index: 2, kind: input, shape index: {}]   ;;  %s1899_s3 = inlined_call_operand.vmem [shape: f32[4,32,8], index: 3, kind: input, shape index: {}]   ;;  %s1900_s4 = inlined_call_operand.vmem [shape: f32[4,32,8], index: 4, kind: input, shape index: {}]   ;;  %s1901_s5 = inlined_call_operand.vmem [shape: f32[4,32,8], index: 5, kind: input, shape index: {}]   ;;  %s1902_s6 = inlined_call_operand.vmem [shape: f32[4,8,32], index: 6, kind: input, shape index: {}]   ;;  %s1903_s7 = inlined_call_operand.hbm [shape: f32[2,8,32], index: 7, kind: output, shape index: {0}]   ;;  %s1904_s8 = inlined_call_operand.hbm [shape: f32[2,4,8,8], index: 8, kind: output, shape index: {1}]  }
   0x1   :  { %1916 = sst [smem:[#allocation20_spill]] %s1896_s0 }
   0x2   :  { %1917 = sst [smem:[#allocation21_spill]] %s1897_s1 }
   0x3   :  { %1918 = sst [smem:[#allocation22_spill]] %s1898_s2 }
   0x4   :  { %1919 = sst [smem:[#allocation23_spill]] %s1899_s3 }
   0x5   :  { %1920 = sst [smem:[#allocation24_spill]] %s1904_s8 }
   0x6   :  { %14 = vsyncpa [#allocation6], 0 }
   0x7   :  { %16 = vsyncpa [#allocation6 + $0x1], 0 }
   0x8   :  { %17 = vsyncpa [#allocation8], 0 }
   0x9   :  { %19 = vsyncpa [#allocation8 + $0x1], 0  ;;  %s1601_s27 = smov 0   ;;  %s1603_s28 = smov 0  }
   0xa   :  { %s1605_s29 = smov 0   ;;  %s1607_s30 = smov 0  }
   0xb   :  { %s1609_s9 = smov 0   ;;  %s1611_s10 = smov 0  }
   0xc   :  { %s1613_s11 = smov 0   ;;  %s1615_s12 = smov 0  }
   0xd   :  { %s1617_s13 = smov 0   ;;  %s1619_s14 = smov 0  }
   0xe   :  { %s1621_s15 = smov 0  }
   0xf LB: > { %1921 = sst [smem:[#allocation11_spill]] %s1517_s29  ;;  %s1189_s16 = sadd.s32 4294967295, %s1549_s15   ;;  %s1549_s15 = sphi %s1621_s15, %s25_s15   ;;  %s1545_s14 = sphi %s1619_s14, %s1954_s14   ;;  %s1541_s13 = sphi %s1617_s13, %s1953_s13   ;;  %s1537_s12 = sphi %s1615_s12, %s1952_s12   ;;  %s1533_s11 = sphi %s1613_s11, %s1951_s11   ;;  %s1529_s10 = sphi %s1611_s10, %s1950_s10   ;;  %s1525_s9 = sphi %s1609_s9, %s1958_s9   ;;  %s1521_s30 = sphi %s1607_s30, %s1957_s30   ;;  %s1517_s29 = sphi %s1605_s29, %s1948_s29   ;;  %s1513_s28 = sphi %s1603_s28, %s1956_s28   ;;  %s1509_s27 = sphi %s1601_s27, %s1955_s27  }
  0x10   : > { %1922 = sst [smem:[#allocation12_spill]] %s1521_s30  ;;  %s1190_s17 = sadd.s32 4294967294, %s1549_s15  }
  0x11   : > { %1923 = sst [smem:[#allocation13_spill]] %s1529_s10  ;;  %s37_s18 = sadd.s32 1, %s1541_s13 }
  0x12   : > { %1924 = sst [smem:[#allocation14_spill]] %s1541_s13  ;;  %s44_s19 = sadd.s32 1, %s1545_s14 }
  0x13   : > { %1925 = sst [smem:[#allocation15_spill]] %s1545_s14  ;;  %p38_p0 = scmp.ge.s32.totalorder %s37_s18, 4 }
  0x14   : > { %s237_s20 = sadd.s32 1, %s1529_s10  ;;  %p247_p1 = scmp.ne.s32.totalorder %s1529_s10, %s1525_s9 }
  0x15   : > { %p1663_p2 = scmp.eq.s32.totalorder %s1189_s16, 7  ;;  %s1960_s18 = smov (%p38_p0, %s37_s18), 0 }
  0x16   : > { %1927 = sst [smem:[#allocation16_spill]] %s1960_s18  ;;  %s1962_s19 = smov (!%p38_p0, %s44_s19), %s1545_s14 }
  0x17   : > { %p1672_p3 = por %p1663_p2, %p247_p1  ;;  %p253_p4 = scmp.ne.s32.totalorder %s1525_s9, %s1521_s30 }
  0x18   : > { %p46_p5 = scmp.ge.s32.totalorder %s1962_s19, 2  ;;  %p1678_p6 = scmp.eq.s32.totalorder %s1190_s17, 7 }
  0x19   : > { %s261_s24 = ssub.s32 %s1541_s13, %s1960_s18  ;;  %s267_s25 = sadd.s32 1, %s1517_s29 }
  0x1a   : > { %s1964_s19 = smov (%p46_p5, %s1962_s19), 0  ;;  %p1689_p7 = por %p1678_p6, %p253_p4 }
  0x1b   : > { %1930 = sst [smem:[#allocation17_spill]] %s1964_s19  ;;  %p277_p8 = scmp.ne.s32.totalorder %s1517_s29, %s1513_s28 }
  0x1c   : > { %s1931_s26 = scalar_select %p1689_p7, 1, 0 }
  0x1d   : > { %s232_s16 = ssub.s32 %s1545_s14, %s1964_s19  ;;  %p283_p9 = scmp.ne.s32.totalorder %s1513_s28, %s1509_s27 }
  0x1e   : > { %p235_p10 = scmp.eq.s32.totalorder %s232_s16, 0  ;;  %s262_s17 = sor.u32 %s261_s24, %s232_s16 }
  0x1f   : > { %p265_p11 = scmp.eq.s32.totalorder %s262_s17, 0  ;;  %p1701_p12 = por %p277_p8, %p1663_p2 }
  0x20   : > { %s1706_s18 = scalar_select %p235_p10, %s1529_s10, %s237_s20  }
  0x21   : > { %s1709_s13 = scalar_select %p265_p11, %s1517_s29, %s267_s25  }
  0x22   : > { %1933 = sst [smem:[#allocation18_spill]] %s1706_s18  ;;  %p1713_p13 = por %p283_p9, %p1678_p6 }
  0x23   : > { %1934 = sst [smem:[#allocation19_spill]] %s1709_s13  ;;  %p1193_p0 = scmp.ge.s32.totalorder %s1549_s15, 1 }
  0x24   : > { %s1935_s8 = scalar_select %p1713_p13, 1, 0 }
  0x25   : > { %p357_p1 = scmp.lt.s32.totalorder %s1549_s15, 9 }
  0x27   : > { %p358_p4 = pnand %p1193_p0, %p357_p1 }
  0x28   : > { %s1909_s21 = sand.u32 (!%p358_p4), 1, %s1525_s9   ;;  %p440_p2 = scmp.lt.s32.totalorder (!%p358_p4), %s1533_s11, 3 }
  0x29   : > { %361 = sbr.rel (%p358_p4) target bundleno = 1228 (0x4cc), region = 48  ;;  %s1723_s20 = sshll.u32 (!%p358_p4), %s1909_s21, 3 }
  0x2a   : > { %p425_p5 = scmp.lt.s32.totalorder (!%p358_p4), %s1537_s12, 1  ;;  %s1936_s1 = sld [smem:[#allocation21_spill]] (!%p358_p4) }
  0x2b   : > { %s1937_s3 = sld [smem:[#allocation23_spill]] (!%p358_p4)  ;;  %p1215_p6 = scmp.ne.s32.totalorder (!%p358_p4), %s1533_s11, 0 }
  0x2c   : > { %s1938_s0 = sld [smem:[#allocation20_spill]] (!%p358_p4) }
  0x2d   : > { %s1939_s2 = sld [smem:[#allocation22_spill]] (!%p358_p4) }
  0x2e   : > { %v1551_v0 = vmov 0.0   ;;  %vm1552_vm0 = vmmov 0   ;;  %s1733_s23 = scalar_select %p440_p2, %s1533_s11, 3  ;;  %vm468_vm1 = vcmask 261120   ;;  %vm544_vm2 = vcmask 64512  }
  0x2f   : > { %1248 = vmatprep.subr.mxu0 %v1551_v0  ;;  %1256 = vmatprep.mubr.msk.f32.mxu0 %vm1552_vm0, %v1551_v0  ;;  %s426_s24 = scalar_select %p425_p5, %s1537_s12, 1 }
  0x30   : > { %1259 = vmatprep.subr.mxu1 %v1551_v0  ;;  %1267 = vmatprep.mubr.msk.f32.mxu1 %vm1552_vm0, %v1551_v0  ;;  %s1737_s25 = sshll.u32 %s1733_s23, 5 }
  0x31   : > { %s449_s21 = scalar_lea.vmem %s1900_s4, %s1737_s25  ;;  %s1743_s19 = sshll.u32 %s426_s24, 3 }
  0x32   : > { %v467_v1 = vld [vmem:[%s449_s21 + $0x18] sm:$0xff]  ;;  %v466_v2 = vld [vmem:[%s449_s21 + $0x10] sm:$0xff]  ;;  %v465_v3 = vld [vmem:[%s449_s21 + $0x8] sm:$0xff]  ;;  %s435_s10 = scalar_lea.vmem %s1936_s1, %s1743_s19  ;;  %s444_s16 = scalar_lea.vmem %s1937_s3, %s1737_s25 }
  0x33   : > { %1249 = vmatpush3.msra.mxu0 %v467_v1  ;;  %v464_v4 = vld [vmem:[%s449_s21] sm:$0xff]  ;;  %v630_v6 = vld [vmem:[%s444_s16 + $0x18] sm:$0xff]  ;;  %v629_v7 = vld [vmem:[%s444_s16 + $0x10] sm:$0xff]  ;;  %s431_s13 = scalar_lea.vmem %s1938_s0, %s1743_s19  ;;  %s454_s21 = scalar_lea.vmem %s1901_s5, %s1737_s25 }
  0x34   : > { %1250 = vmatprep.subr.mxu0 %v1551_v0  ;;  %v463_v5 = vld [vmem:[%s435_s10] sm:$0xff]  ;;  %v628_v8 = vld [vmem:[%s444_s16 + $0x8] sm:$0xff]  ;;  %v550_v11 = vld [vmem:[%s454_s21 + $0x18] sm:$0xff]  ;;  %s1207_s25 = sshll.u32 %s1533_s11, 3  ;;  %s1205_s10 = sshll.u32 %s1733_s23, 3 }
  0x35   : > { %1251 = vmatpush3.msra.mxu0 %v466_v2  ;;  %v627_v9 = vld [vmem:[%s444_s16] sm:$0xff]  ;;  %1260 = vmatpush3.msra.mxu1 %v550_v11  ;;  %v549_v12 = vld [vmem:[%s454_s21 + $0x10] sm:$0xff]  ;;  %v548_v13 = vld [vmem:[%s454_s21 + $0x8] sm:$0xff]  ;;  %s439_s16 = scalar_lea.vmem %s1939_s2, %s1743_s19  ;;  %s543_s29 = scalar_lea.vmem [#allocation3], %s1207_s25 }
  0x36   : > { %1252 = vmatprep.subr.mxu0 %v1551_v0  ;;  %v626_v10 = vld [vmem:[%s431_s13] sm:$0xff]  ;;  %1261 = vmatprep.subr.mxu1 %v1551_v0  ;;  %s624_s19 = scalar_lea.vmem [#allocation4], %s1207_s25  ;;  %s458_s18 = scalar_lea.vmem %s1902_s6, %s1205_s10 }
  0x37   : > { %1253 = vmatpush3.msra.mxu0 %v465_v3  ;;  %1262 = vmatpush3.msra.mxu1 %v549_v12  ;;  %v547_v14 = vld [vmem:[%s454_s21] sm:$0xff]  ;;  %s1914_s21 = sand.u32 1, %s1513_s28   ;;  %s417_s23 = scalar_lea.vmem [#allocation5], %s1723_s20 }
  0x38   : > { %1254 = vmatprep.subr.mxu0 %v1551_v0  ;;  %1263 = vmatprep.subr.mxu1 %v1551_v0  ;;  %v546_v15 = vld [vmem:[%s439_s16] sm:$0xff]  ;;  %s1803_s24 = sshll.u32 %s1914_s21, 3 }
  0x39   : > { %1255 = vmatpush3.msra.mxu0 %v464_v4  ;;  %1264 = vmatpush3.msra.mxu1 %v548_v13  ;;  %v873_v33 = vld [vmem:[%s458_s18] sm:$0xff]  ;;  %s1915_s17 = scalar_lea.vmem [#allocation7], %s1803_s24 }
  0x3a   : > { %1257 = vmatmul.mubr.msk.f32.vlgmr.msra.gmra.mxu0 %vm468_vm1, %v463_v5  ;;  %1270 = vmatprep.subr.mxu0 %v1551_v0 }
  0x3b   : > { %1271 = vmatpush3.msra.mxu0 %v630_v6  ;;  %1278 = vmatprep.mubr.msk.f32.mxu0 %vm1552_vm0, %v1551_v0 }
  0x3c   : > { %1272 = vmatprep.subr.mxu0 %v1551_v0  ;;  %1265 = vmatprep.subr.mxu1 %v1551_v0 }
  0x3d   : > { %1273 = vmatpush3.msra.mxu0 %v629_v7  ;;  %1266 = vmatpush3.msra.mxu1 %v547_v14 }
  0x3e   : > { %1274 = vmatprep.subr.mxu0 %v1551_v0  ;;  %1268 = vmatmul.mubr.msk.f32.vlgmr.msra.gmra.mxu1 %vm468_vm1, %v546_v15 }
  0x3f   : > { %1275 = vmatpush3.msra.mxu0 %v628_v8  ;;  %1281 = vmatprep.subr.mxu1 %v1551_v0 }
  0x40   : > { %1276 = vmatprep.subr.mxu0 %v1551_v0  ;;  %1283 = vmatprep.mubr.msk.f32.mxu1 %vm1552_vm0, %v1551_v0 }
  0x41   : > { %1277 = vmatpush3.msra.mxu0 %v627_v9 }
  0x42   : > { %1279 = vmatmul.mubr.msk.f32.vlgmr.msra.gmra.mxu0 %vm468_vm1, %v626_v10  ;;  %1291 = vmatprep.subr.mxu0 %v1551_v0 }
  0x43   : > { %1293 = vmatprep.mubr.msk.f32.mxu0 %vm1552_vm0, %v1551_v0  ;;  %1292 = vmatpush3.msra.mxu0 %v873_v33 }
  0xfa   : > { %v538_v16 = vpop.f32.mrf.mxu0 }
  0xfb   : > { %545 = vst.msk [vmem:[%s543_s29] sm:$0xff] %vm544_vm2, %v538_v16 }
  0xfc   : > { %v1258_v17 = vpop.f32.mrf.mxu0 }
  0xfe   : > { %v620_v21 = vpop.f32.mrf.mxu1 }
  0xff   : > { %625 = vst.msk [vmem:[%s624_s19] sm:$0xff] %vm544_vm2, %v620_v21 }
 0x100   : > { %v1269_v22 = vpop.f32.mrf.mxu1 }
 0x102   : > { %v707_v18 = vld [vmem:[%s543_s29] sm:$0xff]  ;;  %v701_v19 = vpop.f32.mrf.mxu0 }
 0x103   : > { %1282 = vmatpush3.xpose.msk.msra.mxu1 %vm544_vm2, %v707_v18 }
 0x104   : > { %v1280_v20 = vpop.f32.mrf.mxu0  ;;  %1286 = vmatprep.subr.mxu1 %v1551_v0 }
 0x106   : > { %1284 = vmatmul.mubr.msk.f32.vlgmr.msra.gmra.mxu1 %vm544_vm2, %v701_v19  ;;  %v709_v23 = vld [vmem:[%s624_s19] sm:$0xff] }
 0x107   : > { %1288 = vmatprep.mubr.msk.f32.mxu1 %vm1552_vm0, %v1551_v0  ;;  %1287 = vmatpush3.msra.mxu1 %v709_v23 }
 0x1c6   : > { %v783_v24 = vpop.f32.mrf.mxu1 }
 0x1c7   : > { %v787_v25 = vmul.f32 0.35355338, %v783_v24 }
 0x1c8   : > { %v1285_v26 = vpop.f32.mrf.mxu1 }
 0x1c9   : > { %v788_v27 = vsel %vm544_vm2, %v787_v25, -inf }
 0x1ca   : > { %789 = vmax.xlane.f32.xlu0 %v788_v27 }
 0x253   : > { %v790_v28 = vpop.xlane.xlu0 %789 }
 0x254   : > { %v791_v29 = vsub.f32 %v787_v25, %v790_v28 }
 0x256   : > { %v792_v30 = vmul.f32 1.442695, %v791_v29 }
 0x258   : > { %1399 = vpow2.f32 %v792_v30 }
 0x265   : > { %v1400_v31 = vpop.eup %1399 }
 0x266   : > { %v794_v32 = vsel %vm544_vm2, %v1400_v31, 0.0 }
 0x267   : > { %795 = vadd.xlane.f32.xlu0 %v794_v32 }
 0x2f0   : > { %v796_v34 = vpop.xlane.xlu0 %795 }
 0x2f1   : > { %1401 = vrcp.f32 %v796_v34 }
 0x2fe   : > { %v1402_v35 = vpop.eup %1401 }
 0x2ff   : > { %v798_v36 = vmul.f32 %v1402_v35, %v1400_v31 }
 0x301   : > { %799 = vst.msk [vmem:[%s1915_s17] sm:$0xff] %vm544_vm2, %v798_v36  ;;  %1289 = vmatmul.mubr.msk.f32.vlgmr.msra.gmra.mxu1 %vm544_vm2, %v798_v36 }
 0x3c1   : > { %v869_v37 = vpop.f32.mrf.mxu1 }
 0x3c2   : > { %1294 = vmatmul.mubr.msk.f32.vlgmr.msra.gmra.mxu0 %vm544_vm2, %v869_v37 }
 0x3c3   : > { %v1290_v38 = vpop.f32.mrf.mxu1 }
 0x480   : > { %950 = sbr.rel (%p1215_p6) target bundleno = 1159 (0x487), region = 56 }
 0x482   : > { %v943_v39 = vpop.f32.mrf.mxu0 }
 0x484   : > { %v1295_v40 = vpop.f32.mrf.mxu0 }
 0x485   : > { %v1553_v41 = vmov 0.0  }
 0x486   : > { %951 = vst.msk [vmem:[#allocation2] sm:$0xff] %vm468_vm1, %v1553_v41 }
 0x487 PF: > { %p1216_p8 = scmp.ne.s32.totalorder %s1533_s11, 3 }
 0x48c   : > { %958 = sbr.rel (%p1216_p8) target bundleno = 1177 (0x499), region = 60 }
 0x48d   : > { %v952_v42 = vld [vmem:[#allocation2] sm:$0xff] }
 0x48e   : > { %v953_v43 = vadd.f32 %v952_v42, %v943_v39 }
 0x490   : > { %954 = vst.msk [vmem:[#allocation2] sm:$0xff] %vm468_vm1, %v953_v43 }
 0x497   : > { %v959_v44 = vld [vmem:[#allocation2] sm:$0xff] }
 0x498   : > { %960 = vst.msk [vmem:[%s417_s23] sm:$0xff] %vm468_vm1, %v959_v44 }
 0x499 PF: > { %s1219_s20 = sshll.u32 %s1537_s12, 7  ;;  %s981_s19 = sshll.u32 %s417_s23, 4  ;;  %s982_s19 = int_to_ptr.vmem [resolvable:$true] %s981_s19 }
 0x49a   : > { %s979_s29 = scalar_lea.hbm %s1903_s7, %s1219_s20  ;;  %s1940_s10 = sand.u32 1, %s1525_s9  }
 0x49b   : > { %s962_s13 = scalar_lea.sflag [#allocation6], %s1940_s10  ;;  %s1403_s14 = scalar_lea.vmem %s982_s19, 128 }
 0x49c   : > { %p1404_p9 = scmp.ne.s32.totalorder %s982_s19, %s1403_s14  ;;  %s1554_s18 = smov [#allocation5]  }
 0x49d   : > { %s1407_s21 = sshll.u32 %s1554_s18, 4  ;;  %s1408_s21 = int_to_ptr.vmem [resolvable:$false] %s1407_s21 }
 0x49e   : > { %p1405_p10 = pnand %p1404_p9, %p1672_p3  ;;  %s1409_s17 = scalar_lea.vmem %s1408_s21, 256 }
 0x49f   : > { %p1410_p0 = scmp.lt.s32.totalorder %s982_s19, %s1408_s21  ;;  %p1411_p1 = scmp.lt.s32.totalorder %s1409_s17, %s1403_s14 }
 0x4a0   : > { %p1406_p11 = pneg %p1405_p10 }
 0x4a1   : > { %p1412_p4 = por %p1411_p1, %p1410_p0 }
 0x4a3   : > { %p1413_p2 = pnand %p1412_p4, %p1406_p11 }
 0x4a5   : > { %1416 = shalt.err (!%p1413_p2)
}
 0x4a6   : > { %s1417_s16 = scalar_lea.hbm %s979_s29, 128  ;;  %s1421_s25 = scalar_lea.hbm %s1903_s7, 256 }
 0x4a7   : > { %p1418_p5 = scmp.ne.s32.totalorder %s979_s29, %s1417_s16  ;;  %p1422_p9 = scmp.lt.s32.totalorder %s979_s29, %s1903_s7 }
 0x4a8   : > { %p1423_p10 = scmp.lt.s32.totalorder %s1421_s25, %s1417_s16 }
 0x4a9   : > { %p1419_p6 = pnand %p1418_p5, %p1672_p3 }
 0x4aa   : > { %p1424_p13 = por %p1423_p10, %p1422_p9 }
 0x4ab   : > { %p1420_p8 = pneg %p1419_p6 }
 0x4ad   : > { %p1425_p7 = pnand %p1424_p13, %p1420_p8 }
 0x4af   : > { %1428 = shalt.err (!%p1425_p7)
}
 0x4b0   : > { %1296 = dma.vmem_to_hbm [thread:$0]  (%p1672_p3), %s982_s19, 128, %s979_s29, %s962_s13  }
 0x4b1   : > { %s1220_s21 = sshll.u32 %s1537_s12, 2  ;;  %s1941_s17 = scalar_lea.vmem [#allocation7], %s1803_s24 }
 0x4b2   : > { %s997_s14 = sshll.u32 %s1941_s17, 4  ;;  %s993_s18 = sadd.s32 %s1533_s11, %s1220_s21  ;;  %s998_s14 = int_to_ptr.vmem [resolvable:$true] %s997_s14 }
 0x4b3   : > { %s1221_s23 = sshll.u32 %s993_s18, 7  ;;  %s1942_s16 = sld [smem:[#allocation24_spill]] }
 0x4b4   : > { %s1943_s10 = sand.u32 1, %s1513_s28   ;;  %s1429_s2 = scalar_lea.vmem %s998_s14, 128 }
 0x4b5   : > { %s967_s1 = scalar_lea.sflag [#allocation8], %s1943_s10  ;;  %p1430_p7 = scmp.ne.s32.totalorder %s998_s14, %s1429_s2 }
 0x4b6   : > { %s1555_s22 = smov [#allocation7]  }
 0x4b7   : > { %p1431_p13 = pnand %p1430_p7, %p1701_p12  ;;  %s1433_s3 = sshll.u32 %s1555_s22, 4  ;;  %s1434_s3 = int_to_ptr.vmem [resolvable:$false] %s1433_s3 }
 0x4b8   : > { %s1435_s12 = scalar_lea.vmem %s1434_s3, 256  ;;  %p1436_p3 = scmp.lt.s32.totalorder %s998_s14, %s1434_s3 }
 0x4b9   : > { %s995_s25 = scalar_lea.hbm %s1942_s16, %s1221_s23  ;;  %p1432_p11 = pneg %p1431_p13 }
 0x4ba   : > { %p1437_p0 = scmp.lt.s32.totalorder %s1435_s12, %s1429_s2 }
 0x4bc   : > { %p1438_p1 = por %p1437_p0, %p1436_p3 }
 0x4be   : > { %p1439_p4 = pnand %p1438_p1, %p1432_p11 }
 0x4c0   : > { %1442 = shalt.err (!%p1439_p4)
}
 0x4c1   : > { %s1443_s11 = scalar_lea.hbm %s995_s25, 128  ;;  %s1447_s19 = scalar_lea.hbm %s1942_s16, 1024 }
 0x4c2   : > { %p1444_p2 = scmp.ne.s32.totalorder %s995_s25, %s1443_s11  ;;  %p1448_p8 = scmp.lt.s32.totalorder %s995_s25, %s1942_s16 }
 0x4c3   : > { %p1449_p9 = scmp.lt.s32.totalorder %s1447_s19, %s1443_s11 }
 0x4c4   : > { %p1445_p5 = pnand %p1444_p2, %p1701_p12 }
 0x4c5   : > { %p1450_p10 = por %p1449_p9, %p1448_p8 }
 0x4c6   : > { %p1446_p6 = pneg %p1445_p5 }
 0x4c8   : > { %p1451_p7 = pnand %p1450_p10, %p1446_p6 }
 0x4ca   : > { %1454 = shalt.err (!%p1451_p7)
}
 0x4cb   : > { %1297 = dma.vmem_to_hbm [thread:$0]  (%p1701_p12), %s998_s14, 128, %s995_s25, %s967_s1  }
 0x4cc PF: > { %s1944_s2 = sld [smem:[#allocation12_spill]]  ;;  %p1307_p13 = scmp.ge.s32.totalorder %s1549_s15, 2 }
 0x4cd   : > { %p1945_p11 = scmp.ne.s32.totalorder %s1931_s26, 0 }
 0x4cf   : > { %p1301_p3 = pnand %p1307_p13, %p1945_p11 }
 0x4d1   : > { %p1302_p0 = pneg %p1301_p3 }
 0x4d2   : > { %s1009_s3 = sand.u32 1, %s1944_s2  }
 0x4d3   : > { %s1010_s17 = scalar_lea.sflag [#allocation6], %s1009_s3 }
 0x4d4   : > { %1500 = dma.done.wait (%p1302_p0), %s1010_s17, 128  }
 0x4d5   : > { %1502 = vsyncadd (%p1302_p0), %s1010_s17, 4294967168  ;;  %s1018_s18 = sand.u32 1, %s1509_s27   ;;  %p1946_p1 = scmp.ne.s32.totalorder %s1935_s8, 0 }
 0x4d6   : > { %s1019_s30 = scalar_lea.sflag [#allocation8], %s1018_s18 }
 0x4d7   : > { %p1304_p4 = pnand %p1307_p13, %p1946_p1 }
 0x4d9   : > { %p1305_p2 = pneg %p1304_p4 }
 0x4db   : > { %1504 = dma.done.wait (%p1305_p2), %s1019_s30, 128  }
 0x4dc   : > { %1506 = vsyncadd (%p1305_p2), %s1019_s30, 4294967168  ;;  %s25_s15 = sadd.s32 1, %s1549_s15   ;;  %s1947_s1 = sld [smem:[#allocation11_spill]] }
 0x4dd   : > { %p22_p12 = scmp.ge.s32.totalorder %s25_s15, 10   ;;  %s1948_s29 = sld [smem:[#allocation19_spill]] }
 0x4de   : > { %s1949_s26 = sld [smem:[#allocation13_spill]]  ;;  %s1955_s27 = smov %s1513_s28 }
 0x4df   : > { %s1950_s10 = sld [smem:[#allocation18_spill]]  ;;  %s1957_s30 = smov %s1525_s9 }
 0x4e0   : > { %s1951_s11 = sld [smem:[#allocation14_spill]]  ;;  %24 = sbr.rel (!%p22_p12) target bundleno = 15 (0xf), region = 134 }
 0x4e1   : > { %s1952_s12 = sld [smem:[#allocation15_spill]] }
 0x4e2   : > { %s1953_s13 = sld [smem:[#allocation16_spill]]  ;;  %s1956_s28 = smov %s1947_s1 }
 0x4e3   : > { %s1954_s14 = sld [smem:[#allocation17_spill]] }
 0x4e4   : > { %s1958_s9 = smov %s1949_s26 }
 0x4e5   :  { %1024 = vsyncpa [#allocation6], 1 }
 0x4e6   :  { %1026 = vsyncpa [#allocation6 + $0x1], 1 }
 0x4e7   :  { %1027 = vsyncpa [#allocation8], 1 }
 0x4e8   :  { %1029 = vsyncpa [#allocation8 + $0x1], 1 }

</bundles_post_ra>
